<compile_context>
chip_gen: v6e
topology: v6e:2x2x1
jax: 0.10.0
libtpu: 0.0.40
codegen_flags: <defaults>
</compile_context>

<pallas_src>
from collections import namedtuple
from functools import partial

import jax
import jax.numpy as jnp
import numpy as np
from jax.experimental import pallas as pl
from jax.experimental.pallas import tpu as pltpu

NUM_CLASSES = 7
LANE = 128
SUBLANE = 8


# ----------------------------- Pallas kernel ------------------------------- #
def cls_head_kernel(cls_ref, w_ref, b_ref, out_ref):
    # cls_ref: [Bt, H]     CLS rows only (selected by the BlockSpec index map), bf16
    # w_ref:   [H, Cpad]   classifier weight, zero-padded to 128 lanes, bf16
    # b_ref:   [1, Cpad]   classifier bias, zero-padded, f32
    # out_ref: [Bt, Cpad]  f32 logits (lane-dense -> unmasked vst)
    # Dropout(p=0.1) is identity in eval/inference mode.
    logits = jnp.dot(cls_ref[...], w_ref[...], preferred_element_type=jnp.float32)
    out_ref[...] = (logits + b_ref[...]).astype(out_ref.dtype)


def prepare_classifier_params(w, b):
    """One-time: pad classifier weight/bias to a lane-dense (multiple-of-128) tile.

    w: [H, C] (any float dtype)  ->  [H, Cpad] bf16
    b: [C]                       ->  [1, Cpad] f32
    """
    H, C = w.shape
    Cpad = pl.cdiv(C, LANE) * LANE
    w_pad = jnp.zeros((H, Cpad), jnp.bfloat16).at[:, :C].set(w.astype(jnp.bfloat16))
    b_pad = jnp.zeros((1, Cpad), jnp.float32).at[0, :C].set(b.astype(jnp.float32))
    return w_pad, b_pad, C


@partial(jax.jit, static_argnames=("num_classes", "batch_block"))
def classifier_head(last_hidden_state, w_pad, b_pad, *, num_classes, batch_block=256):
    """pooled = last_hidden_state[:, 0, :]; logits = pooled @ W + b (one Pallas call)."""
    B, S, H = last_hidden_state.shape
    Cpad = w_pad.shape[1]
    assert H % LANE == 0, "hidden size must be a multiple of 128 for the CLS BlockSpec"

    # Free contiguous view: the CLS token of batch row b lives in columns [0, H).
    hs_flat = last_hidden_state.reshape(B, S * H)

    if B <= batch_block:
        Bt = B                      # single step; block == full batch dim (always legal)
    else:
        Bt = (batch_block // SUBLANE) * SUBLANE   # multiple-of-8 batch tile
    grid = (pl.cdiv(B, Bt),)

    out_pad = pl.pallas_call(
        cls_head_kernel,
        out_shape=jax.ShapeDtypeStruct((B, Cpad), jnp.float32),
        grid_spec=pltpu.PrefetchScalarGridSpec(
            num_scalar_prefetch=0,
            grid=grid,
            in_specs=[
                # CLS pooling via the index map: column-block 0 of the [B, S*H] view,
                # so only [Bt, H] elements are DMA'd per step (never the full [B, S, H]).
                pl.BlockSpec((Bt, H), lambda i: (i, 0)),
                pl.BlockSpec((H, Cpad), lambda i: (0, 0)),
                pl.BlockSpec((1, Cpad), lambda i: (0, 0)),
            ],
            out_specs=pl.BlockSpec((Bt, Cpad), lambda i: (i, 0)),
        ),
        compiler_params=pltpu.CompilerParams(
            dimension_semantics=("parallel",),   # shard batch tiles across TCs on v7x
        ),
    )(hs_flat, w_pad, b_pad)

    return out_pad[:, :num_classes]


# ------------------------- synthetic base model ---------------------------- #
def synthetic_base_model(input_ids, attention_mask, params):
    # TODO(synk): the injected `base_model` (a full RoBERTa encoder) has no compact
    # Pallas form here; this deterministic stand-in produces last_hidden_state with
    # the correct [B, S, H] shape and bf16 activation dtype.
    emb = params["word_emb"][input_ids]                        # [B, S, H] gather
    pos = params["pos_emb"][None, : input_ids.shape[1], :]     # [1, S, H]
    h = emb + pos
    mean = jnp.mean(h, axis=-1, keepdims=True)
    var = jnp.var(h, axis=-1, keepdims=True)
    h = (h - mean) * jax.lax.rsqrt(var + 1e-5)
    h = h * attention_mask[..., None].astype(h.dtype)
    return (h.astype(jnp.bfloat16),)                           # outputs[0]


# --------------------------- CustomRoBERTa.forward -------------------------- #
def custom_roberta_forward(input_ids, attention_mask, params):
    outputs = synthetic_base_model(input_ids, attention_mask, params)
    last_hidden_state = outputs[0]                             # [B, S, H]
    logits = classifier_head(
        last_hidden_state,
        params["cls_w_pad"],
        params["cls_b_pad"],
        num_classes=params["num_classes"],
    )
    ModelOutput = namedtuple("ModelOutput", ["logits"])
    return ModelOutput(logits=logits)


# ---------------------------------- main ------------------------------------ #
if __name__ == "__main__":
    B, S, H, VOCAB = 2, 8, 128, 64

    key = jax.random.PRNGKey(0)
    k_we, k_pe, k_w, k_b, k_ids = jax.random.split(key, 5)

    # nn.Linear(hidden_size, num_classes): weight [C, H], bias [C];
    # stored transposed as [H, C] for the kernel's cls @ W layout.
    cls_w = (jax.random.normal(k_w, (H, NUM_CLASSES), jnp.float32)
             * (1.0 / np.sqrt(H))).astype(jnp.bfloat16)
    cls_b = jax.random.normal(k_b, (NUM_CLASSES,), jnp.float32) * 0.01
    cls_w_pad, cls_b_pad, _ = prepare_classifier_params(cls_w, cls_b)

    params = {
        "word_emb": jax.random.normal(k_we, (VOCAB, H), jnp.float32) * 0.02,
        "pos_emb": jax.random.normal(k_pe, (S, H), jnp.float32) * 0.02,
        "cls_w_pad": cls_w_pad,       # [H, 128] bf16, lane-dense
        "cls_b_pad": cls_b_pad,       # [1, 128] f32, lane-dense
        "num_classes": NUM_CLASSES,
    }

    input_ids = jax.random.randint(k_ids, (B, S), 0, VOCAB, dtype=jnp.int32)
    attention_mask = jnp.ones((B, S), dtype=jnp.int32)

    out = custom_roberta_forward(input_ids, attention_mask, params)
    logits = jax.block_until_ready(out.logits)
    assert logits.shape == (B, NUM_CLASSES) and logits.dtype == jnp.float32

    # Pure-JAX/numpy reference for the head (CLS pool + linear), f32 accumulation.
    hs_ref = np.asarray(
        synthetic_base_model(input_ids, attention_mask, params)[0], dtype=np.float32
    )
    cls_ref = hs_ref[:, 0, :]
    ref = cls_ref @ np.asarray(cls_w, dtype=np.float32) + np.asarray(
        cls_b, dtype=np.float32
    )
    np.testing.assert_allclose(np.asarray(logits), ref, rtol=1e-3, atol=1e-3)

    print("KERNEL_OK")
</pallas_src>

<mosaic_0001>
module attributes {stable_mosaic.version = 11 : i64} {
  func.func @cls_head_kernel(%arg0: i32, %arg1: memref<2x128xbf16, #tpu.memory_space<vmem>>, %arg2: memref<128x128xbf16, #tpu.memory_space<vmem>>, %arg3: memref<1x128xf32, #tpu.memory_space<vmem>>, %arg4: memref<2x128xf32, #tpu.memory_space<vmem>>) attributes {dimension_semantics = [#tpu.dimension_semantics<parallel>], iteration_bounds = array<i64: 1>, scalar_prefetch = 0 : i64, scratch_operands = 0 : i64, tpu.core_type = #tpu.core_type<tc>, window_params = [{transform_indices = @transform_0, window_bounds = array<i64: 2, 128>}, {pipeline_mode = #tpu.pipeline_mode<synchronous>, transform_indices = @transform_1, window_bounds = array<i64: 128, 128>}, {pipeline_mode = #tpu.pipeline_mode<synchronous>, transform_indices = @transform_2, window_bounds = array<i64: 1, 128>}, {transform_indices = @transform_3, window_bounds = array<i64: 2, 128>}]} {
    %c0 = arith.constant 0 : index
    %c0_0 = arith.constant 0 : index
    %0 = vector.load %arg1[%c0, %c0_0] : memref<2x128xbf16, #tpu.memory_space<vmem>>, vector<2x128xbf16>
    %c0_1 = arith.constant 0 : index
    %c0_2 = arith.constant 0 : index
    %1 = vector.load %arg2[%c0_1, %c0_2] : memref<128x128xbf16, #tpu.memory_space<vmem>>, vector<128x128xbf16>
    %cst = arith.constant dense<0.000000e+00> : vector<2x128xf32>
    %2 = tpu.matmul %0, %1, %cst {dimension_numbers = #tpu.dot_dimension_numbers<[1], [0], [0], [1], [0, 0, 1, 1], [], []>} : vector<2x128xbf16>, vector<128x128xbf16>, vector<2x128xf32> -> vector<2x128xf32>
    %c0_3 = arith.constant 0 : index
    %c0_4 = arith.constant 0 : index
    %3 = vector.load %arg3[%c0_3, %c0_4] : memref<1x128xf32, #tpu.memory_space<vmem>>, vector<1x128xf32>
    %4 = vector.broadcast %3 : vector<1x128xf32> to vector<2x128xf32>
    %5 = arith.addf %2, %4 : vector<2x128xf32>
    %c0_5 = arith.constant 0 : index
    %c0_6 = arith.constant 0 : index
    %6 = vector.load %arg4[%c0_5, %c0_6] : memref<2x128xf32, #tpu.memory_space<vmem>>, vector<2x128xf32>
    tpu.vector_store %arg4[%c0_5, %c0_6], %5 {strides = array<i32>} : memref<2x128xf32, #tpu.memory_space<vmem>>, vector<2x128xf32>,
    return
  }
  func.func @transform_0(%arg0: i32) -> (i32, i32) {
    %c0_i32 = arith.constant 0 : i32
    %c0_i32_0 = arith.constant 0 : i32
    return %arg0, %c0_i32 : i32, i32
  }
  func.func @transform_1(%arg0: i32) -> (i32, i32) {
    %c0_i32 = arith.constant 0 : i32
    %c0_i32_0 = arith.constant 0 : i32
    %c0_i32_1 = arith.constant 0 : i32
    return %c0_i32, %c0_i32_0 : i32, i32
  }
  func.func @transform_2(%arg0: i32) -> (i32, i32) {
    %c0_i32 = arith.constant 0 : i32
    %c0_i32_0 = arith.constant 0 : i32
    %c0_i32_1 = arith.constant 0 : i32
    return %c0_i32, %c0_i32_0 : i32, i32
  }
  func.func @transform_3(%arg0: i32) -> (i32, i32) {
    %c0_i32 = arith.constant 0 : i32
    %c0_i32_0 = arith.constant 0 : i32
    return %arg0, %c0_i32 : i32, i32
  }
}

</mosaic_0001>

<bundles_post_ra>
// kernel: classifier_head.1
= control target key start
LH: loop header
LB: loop body
LE: loop exit
PB: predicated region body
PF: predicated region fallthrough
CT: control target
= control target key end

     0   :  { %8 = vsyncpa [#allocation3], 0  ;;  %s292_s0 = inlined_call_operand.vmem [shape: bf16[2,1024], index: 0, kind: input, shape index: {}]   ;;  %s293_s1 = inlined_call_operand.hbm [shape: bf16[128,128], index: 1, kind: input, shape index: {}]   ;;  %s294_s2 = inlined_call_operand.vmem [shape: f32[1,128], index: 2, kind: input, shape index: {}]   ;;  %s295_s3 = inlined_call_operand.hbm [shape: f32[2,128], index: 3, kind: output, shape index: {}]  }
   0x1   :  { %9 = vsyncpa [#allocation4], 0  ;;  %s254_s12 = smov [#allocation2]  }
   0x2   :  { %s17_s13 = sshll.u32 %s254_s12, 4  ;;  %s18_s13 = int_to_ptr.vmem [resolvable:$true] %s17_s13 }
   0x3   :  { %s218_s14 = scalar_lea.vmem %s18_s13, 1024  ;;  %p223_p1 = scmp.lt.s32.totalorder %s18_s13, %s18_s13 }
   0x4   :  { %p219_p0 = scmp.ne.s32.totalorder %s18_s13, %s218_s14  ;;  %p224_p2 = scmp.lt.s32.totalorder %s218_s14, %s218_s14 }
   0x6   :  { %p225_p3 = por %p224_p2, %p223_p1 }
   0x8   :  { %p226_p4 = pnand %p225_p3, %p219_p0 }
   0xa   :  { %229 = shalt.err (!%p226_p4)
}
   0xb   :  { %s255_s15 = smov 64   ;;  %s256_s16 = smov 4  }
   0xc   :  { %23 = dma.hbm_to_vmem [thread:$0]  %s293_s1, 1024, %s18_s13, [#allocation3], %s255_s15, %s255_s15, %s256_s16  }
   0xd   :  { %250 = dma.done.wait [#allocation3], 1024  }
   0xe   :  { %251 = vsyncadd [#allocation3], 4294966272  ;;  %v257_v0 = vmov 0.0   ;;  %vm258_vm0 = vmmov 0   ;;  %v202_v1 = vld [vmem:[#allocation2 + $0x38] sm:$0xff]   ;;  %v203_v2 = vld [vmem:[#allocation2 + $0x30] sm:$0xff]  }
   0xf   :  { %176 = vmatprep.subr.bf16.mxu0 %v257_v0  ;;  %192 = vmatprep.mubr.msk.bf16.mxu0 %vm258_vm0, %v257_v0  ;;  %v204_v3 = vld [vmem:[#allocation2 + $0x28] sm:$0xff]   ;;  %v205_v4 = vld [vmem:[#allocation2 + $0x20] sm:$0xff]   ;;  %v206_v5 = vld [vmem:[#allocation2 + $0x18] sm:$0xff]   ;;  %s259_s22 = smov [#allocation5]  }
  0x10   :  { %177 = vmatpush3.bf16.msra.mxu0 %v202_v1  ;;  %v207_v6 = vld [vmem:[#allocation2 + $0x10] sm:$0xff]   ;;  %v208_v7 = vld [vmem:[#allocation2 + $0x8] sm:$0xff]   ;;  %v209_v8 = vld [vmem:[#allocation2] sm:$0xff]   ;;  %s149_s23 = sshll.u32 %s259_s22, 4  ;;  %s150_s23 = int_to_ptr.vmem [resolvable:$true] %s149_s23 }
  0x11   :  { %178 = vmatprep.subr.bf16.mxu0 %v257_v0  ;;  %v30_v9 = vld [vmem:[%s292_s0] sm:$0x1]  ;;  %s230_s24 = scalar_lea.vmem %s150_s23, 32  ;;  %p235_p6 = scmp.lt.s32.totalorder %s150_s23, %s150_s23 }
  0x12   :  { %v158_v10 = vld [vmem:[%s294_s2] ss:$0 sm:$0xff]  ;;  %p231_p5 = scmp.ne.s32.totalorder %s150_s23, %s230_s24  ;;  %p236_p7 = scmp.lt.s32.totalorder %s230_s24, %s230_s24 }
  0x14   :  { %179 = vmatpush3.bf16.msra.mxu0 %v203_v2  ;;  %p237_p8 = por %p236_p7, %p235_p6 }
  0x15   :  { %180 = vmatprep.subr.bf16.mxu0 %v257_v0 }
  0x16   :  { %p238_p9 = pnand %p237_p8, %p231_p5 }
  0x18   :  { %181 = vmatpush3.bf16.msra.mxu0 %v204_v3 }
  0x19   :  { %182 = vmatprep.subr.bf16.mxu0 %v257_v0 }
  0x1c   :  { %183 = vmatpush3.bf16.msra.mxu0 %v205_v4 }
  0x1d   :  { %184 = vmatprep.subr.bf16.mxu0 %v257_v0 }
  0x20   :  { %185 = vmatpush3.bf16.msra.mxu0 %v206_v5 }
  0x21   :  { %186 = vmatprep.subr.bf16.mxu0 %v257_v0 }
  0x24   :  { %187 = vmatpush3.bf16.msra.mxu0 %v207_v6 }
  0x25   :  { %188 = vmatprep.subr.bf16.mxu0 %v257_v0 }
  0x28   :  { %189 = vmatpush3.bf16.msra.mxu0 %v208_v7 }
  0x29   :  { %190 = vmatprep.subr.bf16.mxu0 %v257_v0 }
  0x2c   :  { %191 = vmatpush3.bf16.msra.mxu0 %v209_v8 }
  0x2f   :  { %193 = vmatmul.mubr.bf16.vlgmr.msra.gmra.mxu0 %v30_v9 }
  0xef   :  { %v136_v11 = vpop.f32.mrf.mxu0 }
  0xf0   :  { %v137_v12 = vadd.f32 %v158_v10, %v136_v11 }
  0xf1   :  { %v194_v13 = vpop.f32.mrf.mxu0 }
  0xf2   :  { %142 = vst [vmem:[#allocation5] sm:$0x3] %v137_v12 }
  0xf3   :  { %v139_v14 = vpop.f32.mrf.mxu0 }
  0xf4   :  { %241 = shalt.err (!%p238_p9)
}
  0xf5   :  { %152 = dma.vmem_to_hbm [thread:$0]  %s150_s23, 32, %s295_s3, [#allocation4]   ;;  %v195_v15 = vpop.f32.mrf.mxu0 }
  0xf6   :  { %252 = dma.done.wait [#allocation4], 32  }
  0xf7   :  { %253 = vsyncadd [#allocation4], 4294967264 }
  0xf8   :  { %156 = vsyncpa [#allocation3], 1 }
  0xf9   :  { %157 = vsyncpa [#allocation4], 1 }

</bundles_post_ra>
